<compile_context>
chip_gen: v7x
topology: tpu7x:2x2x1
jax: 0.10.0
libtpu: 0.0.40
codegen_flags: <defaults>
</compile_context>

<pallas_src>
import jax
import jax.numpy as jnp
import numpy as np
from jax.experimental import pallas as pl
from jax.experimental.pallas import tpu as pltpu


def afm_kernel(dense_ref, stack_ref, wlin_ref, blin_ref,
               attWT_ref, attb_ref, atth_ref, attp_ref, out_ref):
    """One batch tile: pairwise interactions, attention, reduction, linear, sigmoid.

    Layout: batch on the lane axis everywhere.
      dense_ref : (D, TB)     stack_ref : (F, E, TB)
      wlin_ref  : (D, 1)      blin_ref  : (1,)  [SMEM]
      attWT_ref : (A, E)      attb_ref  : (A, 1)
      atth_ref  : (A, 1)      attp_ref  : (E, 1)
      out_ref   : (1, TB)
    """
    s = stack_ref[...]                              # (F, E, TB)
    F, E, TB = s.shape

    attWT = attWT_ref[...]                          # (A, E)
    attb = attb_ref[...]                            # (A, 1)
    atth = atth_ref[...]                            # (A, 1)
    attp = attp_ref[...]                            # (E, 1)

    # Pairwise element-wise products, same (i < j) ordering as the PyTorch
    # loop.  Slabs stay resident as (E, TB) and are reused below.
    ewp = []
    logit_rows = []
    for i in range(F - 1):
        for j in range(i + 1, F):
            p = s[i] * s[j]                         # (E, TB), lane-dense
            ewp.append(p)
            # attention MLP on the MXU: (A, E) @ (E, TB) -> (A, TB)
            wx = jnp.maximum(
                jnp.dot(attWT, p, preferred_element_type=jnp.float32) + attb,
                0.0)
            # N=1 head (att_h) as multiply + sublane reduce on VPU/XLU
            logit_rows.append(jnp.sum(atth * wx, axis=0))   # (TB,)
    P = len(ewp)
    logits = jnp.stack(logit_rows, axis=0)          # (P, TB)

    # softmax over the pair axis (dim=1 in PyTorch == axis 0 here)
    m = jnp.max(logits, axis=0, keepdims=True)
    ex = jnp.exp(logits - m)
    sm = ex / jnp.sum(ex, axis=0, keepdims=True)    # (P, TB)

    # attention-weighted sum of interactions (VPU accumulate)
    att_out = jnp.zeros((E, TB), dtype=jnp.float32)
    for p_idx in range(P):
        att_out = att_out + sm[p_idx][None, :] * ewp[p_idx]   # (E, TB)

    # dropout is identity at inference time
    # N=1 projection (att_p) as multiply + sublane reduce
    afm = jnp.sum(attp * att_out, axis=0)           # (TB,)

    # linear term: dense linear + sum of all sparse embedding entries
    dense = dense_ref[...]                          # (D, TB)
    wlin = wlin_ref[...]                            # (D, 1)
    lin = (jnp.sum(wlin * dense, axis=0)
           + blin_ref[0]
           + jnp.sum(s, axis=(0, 1)))               # (TB,)

    out_ref[...] = jax.nn.sigmoid(afm + lin)[None, :]   # (1, TB) lane-dense


def afm_forward(dense_input, sparse_input, params, *, max_tile=512):
    # Embedding lookup (gather) is glue; everything else runs in the kernel.
    embeds = [params["emb"][i][sparse_input[:, i]]
              for i in range(sparse_input.shape[1])]
    stack = jnp.stack(embeds, axis=0).astype(jnp.float32)     # (F, B, E)
    stack_t = jnp.transpose(stack, (0, 2, 1))                  # (F, E, B)
    dense_t = dense_input.astype(jnp.float32).T                # (D, B)

    F, E, B = stack_t.shape
    D = dense_t.shape[0]
    A = params["att_W"].shape[1]

    # Batch tile: multiple of 128 (lane width), capped for VMEM headroom.
    tb = min(max_tile, pl.cdiv(B, 128) * 128)
    b_pad = pl.cdiv(B, tb) * tb
    if b_pad != B:
        stack_t = jnp.pad(stack_t, ((0, 0), (0, 0), (0, b_pad - B)))
        dense_t = jnp.pad(dense_t, ((0, 0), (0, b_pad - B)))

    # Parameters, pre-laid-out for the batch-on-lanes kernel.
    attWT = params["att_W"].T.astype(jnp.float32)              # (A, E)
    attb = params["att_b"].reshape(A, 1).astype(jnp.float32)   # (A, 1)
    atth = params["att_h"].reshape(A, 1).astype(jnp.float32)   # (A, 1)
    attp = params["att_p"].reshape(E, 1).astype(jnp.float32)   # (E, 1)
    wlin = params["w_lin"].reshape(D, 1).astype(jnp.float32)   # (D, 1)
    blin = params["b_lin"].reshape(1).astype(jnp.float32)      # (1,) -> SMEM

    grid = (b_pad // tb,)
    out = pl.pallas_call(
        afm_kernel,
        out_shape=jax.ShapeDtypeStruct((1, b_pad), jnp.float32),
        grid=grid,
        in_specs=[
            pl.BlockSpec((D, tb), lambda i: (0, i)),           # dense (D, TB)
            pl.BlockSpec((F, E, tb), lambda i: (0, 0, i)),     # stack (F, E, TB)
            pl.BlockSpec((D, 1), lambda i: (0, 0)),            # w_lin
            pl.BlockSpec(memory_space=pltpu.MemorySpace.SMEM), # b_lin scalar
            pl.BlockSpec((A, E), lambda i: (0, 0)),            # att_W^T
            pl.BlockSpec((A, 1), lambda i: (0, 0)),            # att_b
            pl.BlockSpec((A, 1), lambda i: (0, 0)),            # att_h
            pl.BlockSpec((E, 1), lambda i: (0, 0)),            # att_p
        ],
        out_specs=pl.BlockSpec((1, tb), lambda i: (0, i)),
        compiler_params=pltpu.CompilerParams(
            dimension_semantics=("parallel",),
            vmem_limit_bytes=64 << 20),
    )(dense_t, stack_t, wlin, blin, attWT, attb, atth, attp)

    return out[:, :B].T                                        # (B, 1)


def afm_reference(dense_input, sparse_input, params):
    """Pure-JAX reference for correctness checking."""
    embeds = [params["emb"][i][sparse_input[:, i]]
              for i in range(sparse_input.shape[1])]
    stack = jnp.stack(embeds, axis=1)
    B, F, E = stack.shape
    e_list = []
    for i in range(F - 1):
        for j in range(i + 1, F):
            e_list.append(stack[:, i, :] * stack[:, j, :])
    ewp = jnp.stack(e_list, axis=1)
    wx = jax.nn.relu(jnp.einsum("bpe,ea->bpa", ewp, params["att_W"])
                     + params["att_b"][0])
    logits = jnp.einsum("bpa,ao->bpo", wx, params["att_h"])
    sm = jax.nn.softmax(logits, axis=1)
    att_out = jnp.sum(sm * ewp, axis=1)
    afm = att_out @ params["att_p"]
    lin = dense_input @ params["w_lin"] + params["b_lin"] \
          + jnp.sum(stack, axis=(1, 2))[:, None]
    return jax.nn.sigmoid(afm + lin)


def xavier_normal(key, shape):
    fan_in, fan_out = shape[0], shape[1]
    std = float(np.sqrt(2.0 / (fan_in + fan_out)))
    return jax.random.normal(key, shape, dtype=jnp.float32) * std


if __name__ == "__main__":
    # Small, deterministic configuration consistent with the module's __init__.
    B = 8                         # batch
    D = 4                         # number of dense features
    feat_nums = [10, 20, 30, 40]  # sparse field cardinalities -> F = 4 fields
    F = len(feat_nums)
    E = 16                        # embed_dim
    A = 16                        # att_size

    key = jax.random.PRNGKey(0)
    keys = jax.random.split(key, 8 + F)

    params = {
        "att_W": xavier_normal(keys[0], (E, A)),
        "att_b": jnp.zeros((1, A), dtype=jnp.float32),
        "att_h": xavier_normal(keys[1], (A, 1)),
        "att_p": xavier_normal(keys[2], (E, 1)),
        "w_lin": xavier_normal(keys[3], (D, 1)),
        "b_lin": jnp.zeros((1, 1), dtype=jnp.float32),
        "emb": [jax.random.normal(keys[4 + i], (feat_nums[i], E),
                                  dtype=jnp.float32) * 0.001
                for i in range(F)],
    }

    dense_input = jax.random.normal(keys[4 + F], (B, D), dtype=jnp.float32)
    sparse_cols = [jax.random.randint(keys[5 + F + (i % 3)], (B,), 0, feat_nums[i])
                   for i in range(F)]
    sparse_input = jnp.stack(sparse_cols, axis=1).astype(jnp.int32)  # (B, F)

    out = afm_forward(dense_input, sparse_input, params)
    out = jax.block_until_ready(out)

    ref = afm_reference(dense_input, sparse_input, params)
    np.testing.assert_allclose(np.asarray(out), np.asarray(ref),
                               rtol=1e-5, atol=1e-5)
    print("KERNEL_OK")
</pallas_src>

<mosaic_0001>
module attributes {stable_mosaic.version = 11 : i64} {
  func.func @afm_kernel(%arg0: i32, %arg1: memref<4x128xf32, #tpu.memory_space<vmem>>, %arg2: memref<4x16x128xf32, #tpu.memory_space<vmem>>, %arg3: memref<4x1xf32, #tpu.memory_space<vmem>>, %arg4: memref<1xf32, #tpu.memory_space<smem>>, %arg5: memref<16x16xf32, #tpu.memory_space<vmem>>, %arg6: memref<16x1xf32, #tpu.memory_space<vmem>>, %arg7: memref<16x1xf32, #tpu.memory_space<vmem>>, %arg8: memref<16x1xf32, #tpu.memory_space<vmem>>, %arg9: memref<1x128xf32, #tpu.memory_space<vmem>>) attributes {dimension_semantics = [#tpu.dimension_semantics<parallel>], iteration_bounds = array<i64: 1>, scalar_prefetch = 0 : i64, scratch_operands = 0 : i64, tpu.core_type = #tpu.core_type<tc>, window_params = [{transform_indices = @transform_0, window_bounds = array<i64: 4, 128>}, {transform_indices = @transform_1, window_bounds = array<i64: 4, 16, 128>}, {pipeline_mode = #tpu.pipeline_mode<synchronous>, transform_indices = @transform_2, window_bounds = array<i64: 4, 1>}, {transform_indices = @transform_3, window_bounds = array<i64: 1>}, {pipeline_mode = #tpu.pipeline_mode<synchronous>, transform_indices = @transform_4, window_bounds = array<i64: 16, 16>}, {pipeline_mode = #tpu.pipeline_mode<synchronous>, transform_indices = @transform_5, window_bounds = array<i64: 16, 1>}, {pipeline_mode = #tpu.pipeline_mode<synchronous>, transform_indices = @transform_6, window_bounds = array<i64: 16, 1>}, {pipeline_mode = #tpu.pipeline_mode<synchronous>, transform_indices = @transform_7, window_bounds = array<i64: 16, 1>}, {transform_indices = @transform_8, window_bounds = array<i64: 1, 128>}]} {
    %c0 = arith.constant 0 : index
    %c0_0 = arith.constant 0 : index
    %c0_1 = arith.constant 0 : index
    %0 = vector.load %arg2[%c0, %c0_0, %c0_1] : memref<4x16x128xf32, #tpu.memory_space<vmem>>, vector<4x16x128xf32>
    %c0_2 = arith.constant 0 : index
    %c0_3 = arith.constant 0 : index
    %1 = vector.load %arg5[%c0_2, %c0_3] : memref<16x16xf32, #tpu.memory_space<vmem>>, vector<16x16xf32>
    %c0_4 = arith.constant 0 : index
    %c0_5 = arith.constant 0 : index
    %2 = vector.load %arg6[%c0_4, %c0_5] : memref<16x1xf32, #tpu.memory_space<vmem>>, vector<16x1xf32>
    %c0_6 = arith.constant 0 : index
    %c0_7 = arith.constant 0 : index
    %3 = vector.load %arg7[%c0_6, %c0_7] : memref<16x1xf32, #tpu.memory_space<vmem>>, vector<16x1xf32>
    %c0_8 = arith.constant 0 : index
    %c0_9 = arith.constant 0 : index
    %4 = vector.load %arg8[%c0_8, %c0_9] : memref<16x1xf32, #tpu.memory_space<vmem>>, vector<16x1xf32>
    %5 = vector.extract_strided_slice %0 {offsets = [0, 0, 0], sizes = [1, 16, 128], strides = [1, 1, 1]} : vector<4x16x128xf32> to vector<1x16x128xf32>
    %6 = vector.shape_cast %5 : vector<1x16x128xf32> to vector<16x128xf32>
    %7 = vector.extract_strided_slice %0 {offsets = [1, 0, 0], sizes = [1, 16, 128], strides = [1, 1, 1]} : vector<4x16x128xf32> to vector<1x16x128xf32>
    %8 = vector.shape_cast %7 : vector<1x16x128xf32> to vector<16x128xf32>
    %9 = arith.mulf %6, %8 : vector<16x128xf32>
    %cst = arith.constant dense<0.000000e+00> : vector<16x128xf32>
    %10 = tpu.matmul %1, %9, %cst {dimension_numbers = #tpu.dot_dimension_numbers<[1], [0], [0], [1], [0, 0, 1, 1], [], []>} : vector<16x16xf32>, vector<16x128xf32>, vector<16x128xf32> -> vector<16x128xf32>
    %11 = vector.broadcast %2 : vector<16x1xf32> to vector<16x128xf32>
    %12 = arith.addf %10, %11 : vector<16x128xf32>
    %cst_10 = arith.constant 0.000000e+00 : f32
    %13 = vector.broadcast %cst_10 : f32 to vector<16x128xf32>
    %14 = arith.maximumf %12, %13 : vector<16x128xf32>
    %15 = vector.broadcast %3 : vector<16x1xf32> to vector<16x128xf32>
    %16 = arith.mulf %15, %14 : vector<16x128xf32>
    %cst_11 = arith.constant dense<0.000000e+00> : vector<128xf32>
    %17 = vector.multi_reduction <add>, %16, %cst_11 [0] : vector<16x128xf32> to vector<128xf32>
    %18 = vector.extract_strided_slice %0 {offsets = [0, 0, 0], sizes = [1, 16, 128], strides = [1, 1, 1]} : vector<4x16x128xf32> to vector<1x16x128xf32>
    %19 = vector.shape_cast %18 : vector<1x16x128xf32> to vector<16x128xf32>
    %20 = vector.extract_strided_slice %0 {offsets = [2, 0, 0], sizes = [1, 16, 128], strides = [1, 1, 1]} : vector<4x16x128xf32> to vector<1x16x128xf32>
    %21 = vector.shape_cast %20 : vector<1x16x128xf32> to vector<16x128xf32>
    %22 = arith.mulf %19, %21 : vector<16x128xf32>
    %cst_12 = arith.constant dense<0.000000e+00> : vector<16x128xf32>
    %23 = tpu.matmul %1, %22, %cst_12 {dimension_numbers = #tpu.dot_dimension_numbers<[1], [0], [0], [1], [0, 0, 1, 1], [], []>} : vector<16x16xf32>, vector<16x128xf32>, vector<16x128xf32> -> vector<16x128xf32>
    %24 = vector.broadcast %2 : vector<16x1xf32> to vector<16x128xf32>
    %25 = arith.addf %23, %24 : vector<16x128xf32>
    %cst_13 = arith.constant 0.000000e+00 : f32
    %26 = vector.broadcast %cst_13 : f32 to vector<16x128xf32>
    %27 = arith.maximumf %25, %26 : vector<16x128xf32>
    %28 = vector.broadcast %3 : vector<16x1xf32> to vector<16x128xf32>
    %29 = arith.mulf %28, %27 : vector<16x128xf32>
    %cst_14 = arith.constant dense<0.000000e+00> : vector<128xf32>
    %30 = vector.multi_reduction <add>, %29, %cst_14 [0] : vector<16x128xf32> to vector<128xf32>
    %31 = vector.extract_strided_slice %0 {offsets = [0, 0, 0], sizes = [1, 16, 128], strides = [1, 1, 1]} : vector<4x16x128xf32> to vector<1x16x128xf32>
    %32 = vector.shape_cast %31 : vector<1x16x128xf32> to vector<16x128xf32>
    %33 = vector.extract_strided_slice %0 {offsets = [3, 0, 0], sizes = [1, 16, 128], strides = [1, 1, 1]} : vector<4x16x128xf32> to vector<1x16x128xf32>
    %34 = vector.shape_cast %33 : vector<1x16x128xf32> to vector<16x128xf32>
    %35 = arith.mulf %32, %34 : vector<16x128xf32>
    %cst_15 = arith.constant dense<0.000000e+00> : vector<16x128xf32>
    %36 = tpu.matmul %1, %35, %cst_15 {dimension_numbers = #tpu.dot_dimension_numbers<[1], [0], [0], [1], [0, 0, 1, 1], [], []>} : vector<16x16xf32>, vector<16x128xf32>, vector<16x128xf32> -> vector<16x128xf32>
    %37 = vector.broadcast %2 : vector<16x1xf32> to vector<16x128xf32>
    %38 = arith.addf %36, %37 : vector<16x128xf32>
    %cst_16 = arith.constant 0.000000e+00 : f32
    %39 = vector.broadcast %cst_16 : f32 to vector<16x128xf32>
    %40 = arith.maximumf %38, %39 : vector<16x128xf32>
    %41 = vector.broadcast %3 : vector<16x1xf32> to vector<16x128xf32>
    %42 = arith.mulf %41, %40 : vector<16x128xf32>
    %cst_17 = arith.constant dense<0.000000e+00> : vector<128xf32>
    %43 = vector.multi_reduction <add>, %42, %cst_17 [0] : vector<16x128xf32> to vector<128xf32>
    %44 = vector.extract_strided_slice %0 {offsets = [1, 0, 0], sizes = [1, 16, 128], strides = [1, 1, 1]} : vector<4x16x128xf32> to vector<1x16x128xf32>
    %45 = vector.shape_cast %44 : vector<1x16x128xf32> to vector<16x128xf32>
    %46 = vector.extract_strided_slice %0 {offsets = [2, 0, 0], sizes = [1, 16, 128], strides = [1, 1, 1]} : vector<4x16x128xf32> to vector<1x16x128xf32>
    %47 = vector.shape_cast %46 : vector<1x16x128xf32> to vector<16x128xf32>
    %48 = arith.mulf %45, %47 : vector<16x128xf32>
    %cst_18 = arith.constant dense<0.000000e+00> : vector<16x128xf32>
    %49 = tpu.matmul %1, %48, %cst_18 {dimension_numbers = #tpu.dot_dimension_numbers<[1], [0], [0], [1], [0, 0, 1, 1], [], []>} : vector<16x16xf32>, vector<16x128xf32>, vector<16x128xf32> -> vector<16x128xf32>
    %50 = vector.broadcast %2 : vector<16x1xf32> to vector<16x128xf32>
    %51 = arith.addf %49, %50 : vector<16x128xf32>
    %cst_19 = arith.constant 0.000000e+00 : f32
    %52 = vector.broadcast %cst_19 : f32 to vector<16x128xf32>
    %53 = arith.maximumf %51, %52 : vector<16x128xf32>
    %54 = vector.broadcast %3 : vector<16x1xf32> to vector<16x128xf32>
    %55 = arith.mulf %54, %53 : vector<16x128xf32>
    %cst_20 = arith.constant dense<0.000000e+00> : vector<128xf32>
    %56 = vector.multi_reduction <add>, %55, %cst_20 [0] : vector<16x128xf32> to vector<128xf32>
    %57 = vector.extract_strided_slice %0 {offsets = [1, 0, 0], sizes = [1, 16, 128], strides = [1, 1, 1]} : vector<4x16x128xf32> to vector<1x16x128xf32>
    %58 = vector.shape_cast %57 : vector<1x16x128xf32> to vector<16x128xf32>
    %59 = vector.extract_strided_slice %0 {offsets = [3, 0, 0], sizes = [1, 16, 128], strides = [1, 1, 1]} : vector<4x16x128xf32> to vector<1x16x128xf32>
    %60 = vector.shape_cast %59 : vector<1x16x128xf32> to vector<16x128xf32>
    %61 = arith.mulf %58, %60 : vector<16x128xf32>
    %cst_21 = arith.constant dense<0.000000e+00> : vector<16x128xf32>
    %62 = tpu.matmul %1, %61, %cst_21 {dimension_numbers = #tpu.dot_dimension_numbers<[1], [0], [0], [1], [0, 0, 1, 1], [], []>} : vector<16x16xf32>, vector<16x128xf32>, vector<16x128xf32> -> vector<16x128xf32>
    %63 = vector.broadcast %2 : vector<16x1xf32> to vector<16x128xf32>
    %64 = arith.addf %62, %63 : vector<16x128xf32>
    %cst_22 = arith.constant 0.000000e+00 : f32
    %65 = vector.broadcast %cst_22 : f32 to vector<16x128xf32>
    %66 = arith.maximumf %64, %65 : vector<16x128xf32>
    %67 = vector.broadcast %3 : vector<16x1xf32> to vector<16x128xf32>
    %68 = arith.mulf %67, %66 : vector<16x128xf32>
    %cst_23 = arith.constant dense<0.000000e+00> : vector<128xf32>
    %69 = vector.multi_reduction <add>, %68, %cst_23 [0] : vector<16x128xf32> to vector<128xf32>
    %70 = vector.extract_strided_slice %0 {offsets = [2, 0, 0], sizes = [1, 16, 128], strides = [1, 1, 1]} : vector<4x16x128xf32> to vector<1x16x128xf32>
    %71 = vector.shape_cast %70 : vector<1x16x128xf32> to vector<16x128xf32>
    %72 = vector.extract_strided_slice %0 {offsets = [3, 0, 0], sizes = [1, 16, 128], strides = [1, 1, 1]} : vector<4x16x128xf32> to vector<1x16x128xf32>
    %73 = vector.shape_cast %72 : vector<1x16x128xf32> to vector<16x128xf32>
    %74 = arith.mulf %71, %73 : vector<16x128xf32>
    %cst_24 = arith.constant dense<0.000000e+00> : vector<16x128xf32>
    %75 = tpu.matmul %1, %74, %cst_24 {dimension_numbers = #tpu.dot_dimension_numbers<[1], [0], [0], [1], [0, 0, 1, 1], [], []>} : vector<16x16xf32>, vector<16x128xf32>, vector<16x128xf32> -> vector<16x128xf32>
    %76 = vector.broadcast %2 : vector<16x1xf32> to vector<16x128xf32>
    %77 = arith.addf %75, %76 : vector<16x128xf32>
    %cst_25 = arith.constant 0.000000e+00 : f32
    %78 = vector.broadcast %cst_25 : f32 to vector<16x128xf32>
    %79 = arith.maximumf %77, %78 : vector<16x128xf32>
    %80 = vector.broadcast %3 : vector<16x1xf32> to vector<16x128xf32>
    %81 = arith.mulf %80, %79 : vector<16x128xf32>
    %cst_26 = arith.constant dense<0.000000e+00> : vector<128xf32>
    %82 = vector.multi_reduction <add>, %81, %cst_26 [0] : vector<16x128xf32> to vector<128xf32>
    %83 = vector.shape_cast %17 : vector<128xf32> to vector<1x128xf32>
    %84 = vector.shape_cast %30 : vector<128xf32> to vector<1x128xf32>
    %85 = vector.shape_cast %43 : vector<128xf32> to vector<1x128xf32>
    %86 = vector.shape_cast %56 : vector<128xf32> to vector<1x128xf32>
    %87 = vector.shape_cast %69 : vector<128xf32> to vector<1x128xf32>
    %88 = vector.shape_cast %82 : vector<128xf32> to vector<1x128xf32>
    %89 = tpu.concatenate %83, %84, %85, %86, %87, %88 in 0 : vector<1x128xf32>, vector<1x128xf32>, vector<1x128xf32>, vector<1x128xf32>, vector<1x128xf32>, vector<1x128xf32> -> vector<6x128xf32>
    %cst_27 = arith.constant dense<0xFF800000> : vector<128xf32>
    %90 = vector.multi_reduction <maximumf>, %89, %cst_27 [0] : vector<6x128xf32> to vector<128xf32>
    %91 = vector.shape_cast %90 : vector<128xf32> to vector<1x128xf32>
    %92 = vector.broadcast %91 : vector<1x128xf32> to vector<6x128xf32>
    %93 = arith.subf %89, %92 : vector<6x128xf32>
    %94 = math.exp %93 : vector<6x128xf32>
    %cst_28 = arith.constant dense<0.000000e+00> : vector<128xf32>
    %95 = vector.multi_reduction <add>, %94, %cst_28 [0] : vector<6x128xf32> to vector<128xf32>
    %96 = vector.shape_cast %95 : vector<128xf32> to vector<1x128xf32>
    %97 = vector.broadcast %96 : vector<1x128xf32> to vector<6x128xf32>
    %98 = arith.divf %94, %97 : vector<6x128xf32>
    %cst_29 = arith.constant 0.000000e+00 : f32
    %99 = vector.broadcast %cst_29 : f32 to vector<16x128xf32>
    %100 = vector.extract_strided_slice %98 {offsets = [0, 0], sizes = [1, 128], strides = [1, 1]} : vector<6x128xf32> to vector<1x128xf32>
    %101 = vector.shape_cast %100 : vector<1x128xf32> to vector<128xf32>
    %102 = vector.shape_cast %101 : vector<128xf32> to vector<1x128xf32>
    %103 = vector.broadcast %102 : vector<1x128xf32> to vector<16x128xf32>
    %104 = arith.mulf %103, %9 : vector<16x128xf32>
    %105 = arith.addf %99, %104 : vector<16x128xf32>
    %106 = vector.extract_strided_slice %98 {offsets = [1, 0], sizes = [1, 128], strides = [1, 1]} : vector<6x128xf32> to vector<1x128xf32>
    %107 = vector.shape_cast %106 : vector<1x128xf32> to vector<128xf32>
    %108 = vector.shape_cast %107 : vector<128xf32> to vector<1x128xf32>
    %109 = vector.broadcast %108 : vector<1x128xf32> to vector<16x128xf32>
    %110 = arith.mulf %109, %22 : vector<16x128xf32>
    %111 = arith.addf %105, %110 : vector<16x128xf32>
    %112 = vector.extract_strided_slice %98 {offsets = [2, 0], sizes = [1, 128], strides = [1, 1]} : vector<6x128xf32> to vector<1x128xf32>
    %113 = vector.shape_cast %112 : vector<1x128xf32> to vector<128xf32>
    %114 = vector.shape_cast %113 : vector<128xf32> to vector<1x128xf32>
    %115 = vector.broadcast %114 : vector<1x128xf32> to vector<16x128xf32>
    %116 = arith.mulf %115, %35 : vector<16x128xf32>
    %117 = arith.addf %111, %116 : vector<16x128xf32>
    %118 = vector.extract_strided_slice %98 {offsets = [3, 0], sizes = [1, 128], strides = [1, 1]} : vector<6x128xf32> to vector<1x128xf32>
    %119 = vector.shape_cast %118 : vector<1x128xf32> to vector<128xf32>
    %120 = vector.shape_cast %119 : vector<128xf32> to vector<1x128xf32>
    %121 = vector.broadcast %120 : vector<1x128xf32> to vector<16x128xf32>
    %122 = arith.mulf %121, %48 : vector<16x128xf32>
    %123 = arith.addf %117, %122 : vector<16x128xf32>
    %124 = vector.extract_strided_slice %98 {offsets = [4, 0], sizes = [1, 128], strides = [1, 1]} : vector<6x128xf32> to vector<1x128xf32>
    %125 = vector.shape_cast %124 : vector<1x128xf32> to vector<128xf32>
    %126 = vector.shape_cast %125 : vector<128xf32> to vector<1x128xf32>
    %127 = vector.broadcast %126 : vector<1x128xf32> to vector<16x128xf32>
    %128 = arith.mulf %127, %61 : vector<16x128xf32>
    %129 = arith.addf %123, %128 : vector<16x128xf32>
    %130 = vector.extract_strided_slice %98 {offsets = [5, 0], sizes = [1, 128], strides = [1, 1]} : vector<6x128xf32> to vector<1x128xf32>
    %131 = vector.shape_cast %130 : vector<1x128xf32> to vector<128xf32>
    %132 = vector.shape_cast %131 : vector<128xf32> to vector<1x128xf32>
    %133 = vector.broadcast %132 : vector<1x128xf32> to vector<16x128xf32>
    %134 = arith.mulf %133, %74 : vector<16x128xf32>
    %135 = arith.addf %129, %134 : vector<16x128xf32>
    %136 = vector.broadcast %4 : vector<16x1xf32> to vector<16x128xf32>
    %137 = arith.mulf %136, %135 : vector<16x128xf32>
    %cst_30 = arith.constant dense<0.000000e+00> : vector<128xf32>
    %138 = vector.multi_reduction <add>, %137, %cst_30 [0] : vector<16x128xf32> to vector<128xf32>
    %c0_31 = arith.constant 0 : index
    %c0_32 = arith.constant 0 : index
    %139 = vector.load %arg1[%c0_31, %c0_32] : memref<4x128xf32, #tpu.memory_space<vmem>>, vector<4x128xf32>
    %c0_33 = arith.constant 0 : index
    %c0_34 = arith.constant 0 : index
    %140 = vector.load %arg3[%c0_33, %c0_34] : memref<4x1xf32, #tpu.memory_space<vmem>>, vector<4x1xf32>
    %141 = vector.broadcast %140 : vector<4x1xf32> to vector<4x128xf32>
    %142 = arith.mulf %141, %139 : vector<4x128xf32>
    %cst_35 = arith.constant dense<0.000000e+00> : vector<128xf32>
    %143 = vector.multi_reduction <add>, %142, %cst_35 [0] : vector<4x128xf32> to vector<128xf32>
    %c0_36 = arith.constant 0 : index
    %144 = memref.load %arg4[%c0_36] : memref<1xf32, #tpu.memory_space<smem>>
    %145 = vector.broadcast %144 : f32 to vector<128xf32>
    %146 = arith.addf %143, %145 : vector<128xf32>
    %cst_37 = arith.constant dense<0.000000e+00> : vector<128xf32>
    %147 = vector.multi_reduction <add>, %0, %cst_37 [0, 1] : vector<4x16x128xf32> to vector<128xf32>
    %148 = arith.addf %146, %147 : vector<128xf32>
    %149 = arith.addf %138, %148 : vector<128xf32>
    %150 = arith.negf %149 : vector<128xf32>
    %151 = math.exp %150 : vector<128xf32>
    %cst_38 = arith.constant 1.000000e+00 : f32
    %152 = vector.broadcast %cst_38 : f32 to vector<128xf32>
    %153 = arith.addf %152, %151 : vector<128xf32>
    %154 = arith.divf %152, %153 : vector<128xf32>
    %155 = vector.shape_cast %154 : vector<128xf32> to vector<1x128xf32>
    %c0_39 = arith.constant 0 : index
    %c0_40 = arith.constant 0 : index
    %156 = vector.load %arg9[%c0_39, %c0_40] : memref<1x128xf32, #tpu.memory_space<vmem>>, vector<1x128xf32>
    tpu.vector_store %arg9[%c0_39, %c0_40], %155 {strides = array<i32>} : memref<1x128xf32, #tpu.memory_space<vmem>>, vector<1x128xf32>,
    return
  }
  func.func @transform_0(%arg0: i32) -> (i32, i32) {
    %c0_i32 = arith.constant 0 : i32
    %c0_i32_0 = arith.constant 0 : i32
    return %c0_i32, %arg0 : i32, i32
  }
  func.func @transform_1(%arg0: i32) -> (i32, i32, i32) {
    %c0_i32 = arith.constant 0 : i32
    %c0_i32_0 = arith.constant 0 : i32
    %c0_i32_1 = arith.constant 0 : i32
    return %c0_i32, %c0_i32_0, %arg0 : i32, i32, i32
  }
  func.func @transform_2(%arg0: i32) -> (i32, i32) {
    %c0_i32 = arith.constant 0 : i32
    %c0_i32_0 = arith.constant 0 : i32
    %c0_i32_1 = arith.constant 0 : i32
    return %c0_i32, %c0_i32_0 : i32, i32
  }
  func.func @transform_3(%arg0: i32) -> i32 {
    %c0_i32 = arith.constant 0 : i32
    %c0_i32_0 = arith.constant 0 : i32
    return %c0_i32 : i32
  }
  func.func @transform_4(%arg0: i32) -> (i32, i32) {
    %c0_i32 = arith.constant 0 : i32
    %c0_i32_0 = arith.constant 0 : i32
    %c0_i32_1 = arith.constant 0 : i32
    return %c0_i32, %c0_i32_0 : i32, i32
  }
  func.func @transform_5(%arg0: i32) -> (i32, i32) {
    %c0_i32 = arith.constant 0 : i32
    %c0_i32_0 = arith.constant 0 : i32
    %c0_i32_1 = arith.constant 0 : i32
    return %c0_i32, %c0_i32_0 : i32, i32
  }
  func.func @transform_6(%arg0: i32) -> (i32, i32) {
    %c0_i32 = arith.constant 0 : i32
    %c0_i32_0 = arith.constant 0 : i32
    %c0_i32_1 = arith.constant 0 : i32
    return %c0_i32, %c0_i32_0 : i32, i32
  }
  func.func @transform_7(%arg0: i32) -> (i32, i32) {
    %c0_i32 = arith.constant 0 : i32
    %c0_i32_0 = arith.constant 0 : i32
    %c0_i32_1 = arith.constant 0 : i32
    return %c0_i32, %c0_i32_0 : i32, i32
  }
  func.func @transform_8(%arg0: i32) -> (i32, i32) {
    %c0_i32 = arith.constant 0 : i32
    %c0_i32_0 = arith.constant 0 : i32
    return %c0_i32, %arg0 : i32, i32
  }
}

</mosaic_0001>

<bundles_post_ra>
// kernel: tpu_custom_call.1
= control target key start
LH: loop header
LB: loop body
LE: loop exit
PB: predicated region body
PF: predicated region fallthrough
CT: control target
= control target key end

     0   :  { %14 = vsyncpa [#allocation4], 0  ;;  %s1394_s0 = inlined_call_operand.hbm [shape: f32[4,128], index: 0, kind: input, shape index: {}]   ;;  %s1395_s1 = inlined_call_operand.hbm [shape: f32[4,16,128], index: 1, kind: input, shape index: {}]   ;;  %s1396_s2 = inlined_call_operand.hbm [shape: f32[4,1], index: 2, kind: input, shape index: {}]   ;;  %s1397_s3 = inlined_call_operand.<no memory space> [shape: f32[1], index: 3, kind: input, shape index: {}]   ;;  %s1398_s4 = inlined_call_operand.hbm [shape: f32[16,16], index: 4, kind: input, shape index: {}]   ;;  %s1399_s5 = inlined_call_operand.hbm [shape: f32[16,1], index: 5, kind: input, shape index: {}]   ;;  %s1400_s6 = inlined_call_operand.hbm [shape: f32[16,1], index: 6, kind: input, shape index: {}]   ;;  %s1401_s7 = inlined_call_operand.hbm [shape: f32[16,1], index: 7, kind: input, shape index: {}]   ;;  %s1402_s8 = inlined_call_operand.hbm [shape: f32[1,128], index: 8, kind: output, shape index: {}]  }
   0x1   :  { %15 = vsyncpa [#allocation7], 0 }
   0x2   :  { %16 = vsyncpa [#allocation10], 0 }
   0x3   :  { %17 = vsyncpa [#allocation13], 0 }
   0x4   :  { %18 = vsyncpa [#allocation5], 0  ;;  %s1158_s27 = smov [#allocation6]   ;;  %s972_s9 = scalar_lea.hbm %s1395_s1, 1024 }
   0x5   :  { %s34_s28 = sshll.u32 %s1158_s27, 4  ;;  %p973_p0 = scmp.ne.s32.totalorder %s1395_s1, %s972_s9  ;;  %s35_s28 = int_to_ptr.vmem [resolvable:$true] %s34_s28 }
   0x6   :  { %p976_p1 = scmp.lt.u32.totalorder %s972_s9, %s1395_s1 }
   0x8   :  { %p978_p2 = pnand %p976_p1, %p973_p0 }
   0xa   :  { %981 = shalt.err (!%p978_p2)
}
   0xb   :  { %s982_s14 = scalar_lea.vmem %s35_s28, 1024  ;;  %p987_p4 = scmp.lt.s32.totalorder %s35_s28, %s35_s28 }
   0xc   :  { %p983_p3 = scmp.ne.s32.totalorder %s35_s28, %s982_s14  ;;  %p988_p5 = scmp.lt.s32.totalorder %s982_s14, %s982_s14 }
   0xe   :  { %p989_p6 = por %p988_p5, %p987_p4 }
  0x10   :  { %p990_p7 = pnand %p989_p6, %p983_p3 }
  0x12   :  { %993 = shalt.err (!%p990_p7)
}
  0x13   :  { %s1159_s15 = smov 128   ;;  %s1160_s16 = smov 8  }
  0x14   :  { %40 = dma.hbm_to_vmem [thread:$0]  %s1395_s1, 1024, %s35_s28, [#allocation7], %s1159_s15, %s1159_s15, %s1160_s16  }
  0x15   :  { %s1161_s19 = smov [#allocation9]   ;;  %s1162_s21 = smov [#allocation12]  }
  0x16   :  { %s58_s20 = sshll.u32 %s1161_s19, 4  ;;  %s82_s22 = sshll.u32 %s1162_s21, 4  ;;  %s59_s20 = int_to_ptr.vmem [resolvable:$true] %s58_s20  ;;  %s83_s22 = int_to_ptr.vmem [resolvable:$true] %s82_s22 }
  0x17   :  { %s994_s25 = scalar_lea.hbm %s1398_s4, 256 }
  0x18   :  { %p995_p8 = scmp.ne.s32.totalorder %s1398_s4, %s994_s25  ;;  %p998_p9 = scmp.lt.u32.totalorder %s994_s25, %s1398_s4 }
  0x1a   :  { %p1000_p10 = pnand %p998_p9, %p995_p8 }
  0x1c   :  { %1003 = shalt.err (!%p1000_p10)
}
  0x1d   :  { %s1004_s1 = scalar_lea.vmem %s59_s20, 256  ;;  %p1009_p12 = scmp.lt.s32.totalorder %s59_s20, %s59_s20 }
  0x1e   :  { %p1005_p11 = scmp.ne.s32.totalorder %s59_s20, %s1004_s1  ;;  %p1010_p13 = scmp.lt.s32.totalorder %s1004_s1, %s1004_s1 }
  0x20   :  { %p1011_p0 = por %p1010_p13, %p1009_p12 }
  0x22   :  { %p1012_p1 = pnand %p1011_p0, %p1005_p11 }
  0x24   :  { %1015 = shalt.err (!%p1012_p1)
}
  0x25   :  { %64 = dma.hbm_to_vmem [thread:$0]  %s1398_s4, 256, %s59_s20, [#allocation10], %s1159_s15, %s1159_s15, %s1160_s16  }
  0x26   :  { %s1016_s12 = scalar_lea.hbm %s1400_s6, 256 }
  0x27   :  { %p1017_p2 = scmp.ne.s32.totalorder %s1400_s6, %s1016_s12  ;;  %p1020_p3 = scmp.lt.u32.totalorder %s1016_s12, %s1400_s6 }
  0x29   :  { %p1022_p4 = pnand %p1020_p3, %p1017_p2 }
  0x2b   :  { %1025 = shalt.err (!%p1022_p4)
}
  0x2c   :  { %s1026_s19 = scalar_lea.vmem %s83_s22, 256  ;;  %p1031_p6 = scmp.lt.s32.totalorder %s83_s22, %s83_s22 }
  0x2d   :  { %p1027_p5 = scmp.ne.s32.totalorder %s83_s22, %s1026_s19  ;;  %p1032_p7 = scmp.lt.s32.totalorder %s1026_s19, %s1026_s19 }
  0x2f   :  { %p1033_p8 = por %p1032_p7, %p1031_p6 }
  0x31   :  { %p1034_p9 = pnand %p1033_p8, %p1027_p5 }
  0x33   :  { %1037 = shalt.err (!%p1034_p9)
}
  0x34   :  { %88 = dma.hbm_to_vmem [thread:$0]  %s1400_s6, 256, %s83_s22, [#allocation13], %s1159_s15, %s1159_s15, %s1160_s16  }
  0x35   :  { %s1163_s21 = smov [#allocation3]   ;;  %s1164_s24 = smov [#allocation8]  }
  0x36   :  { %s25_s23 = sshll.u32 %s1163_s21, 4  ;;  %s47_s25 = sshll.u32 %s1164_s24, 4  ;;  %s26_s23 = int_to_ptr.vmem [resolvable:$true] %s25_s23  ;;  %s48_s25 = int_to_ptr.vmem [resolvable:$true] %s47_s25 }
  0x37   :  { %s1038_s29 = scalar_lea.hbm %s1394_s0, 64 }
  0x38   :  { %p1039_p10 = scmp.ne.s32.totalorder %s1394_s0, %s1038_s29  ;;  %p1042_p11 = scmp.lt.u32.totalorder %s1038_s29, %s1394_s0 }
  0x3a   :  { %p1044_p12 = pnand %p1042_p11, %p1039_p10 }
  0x3c   :  { %1047 = shalt.err (!%p1044_p12)
}
  0x3d   :  { %s1048_s6 = scalar_lea.vmem %s26_s23, 64  ;;  %p1053_p0 = scmp.lt.s32.totalorder %s26_s23, %s26_s23 }
  0x3e   :  { %p1049_p13 = scmp.ne.s32.totalorder %s26_s23, %s1048_s6  ;;  %p1054_p1 = scmp.lt.s32.totalorder %s1048_s6, %s1048_s6 }
  0x40   :  { %p1055_p2 = por %p1054_p1, %p1053_p0 }
  0x42   :  { %p1056_p3 = pnand %p1055_p2, %p1049_p13 }
  0x44   :  { %1059 = shalt.err (!%p1056_p3)
}
  0x45   :  { %28 = dma.hbm_to_vmem [thread:$0]  %s1394_s0, 64, %s26_s23, [#allocation4]  }
  0x46   :  { %s1060_s13 = scalar_lea.hbm %s1396_s2, 64 }
  0x47   :  { %p1061_p4 = scmp.ne.s32.totalorder %s1396_s2, %s1060_s13  ;;  %p1064_p5 = scmp.lt.u32.totalorder %s1060_s13, %s1396_s2 }
  0x49   :  { %p1066_p6 = pnand %p1064_p5, %p1061_p4 }
  0x4b   :  { %1069 = shalt.err (!%p1066_p6)
}
  0x4c   :  { %s1070_s4 = scalar_lea.vmem %s48_s25, 64  ;;  %p1075_p8 = scmp.lt.s32.totalorder %s48_s25, %s48_s25 }
  0x4d   :  { %p1071_p7 = scmp.ne.s32.totalorder %s48_s25, %s1070_s4  ;;  %p1076_p9 = scmp.lt.s32.totalorder %s1070_s4, %s1070_s4 }
  0x4f   :  { %p1077_p10 = por %p1076_p9, %p1075_p8 }
  0x51   :  { %p1078_p11 = pnand %p1077_p10, %p1071_p7 }
  0x53   :  { %1081 = shalt.err (!%p1078_p11)
}
  0x54   :  { %50 = dma.hbm_to_vmem [thread:$0]  %s1396_s2, 64, %s48_s25, [#allocation7]  }
  0x55   :  { %s1165_s21 = smov [#allocation11]   ;;  %s1166_s24 = smov [#allocation14]  }
  0x56   :  { %s70_s23 = sshll.u32 %s1165_s21, 4  ;;  %s94_s26 = sshll.u32 %s1166_s24, 4  ;;  %s71_s23 = int_to_ptr.vmem [resolvable:$true] %s70_s23  ;;  %s95_s26 = int_to_ptr.vmem [resolvable:$true] %s94_s26 }
  0x57   :  { %s1082_s30 = scalar_lea.hbm %s1399_s5, 256 }
  0x58   :  { %p1083_p12 = scmp.ne.s32.totalorder %s1399_s5, %s1082_s30  ;;  %p1086_p13 = scmp.lt.u32.totalorder %s1082_s30, %s1399_s5 }
  0x5a   :  { %p1088_p0 = pnand %p1086_p13, %p1083_p12 }
  0x5c   :  { %1091 = shalt.err (!%p1088_p0)
}
  0x5d   :  { %s1092_s2 = scalar_lea.vmem %s71_s23, 256  ;;  %p1097_p2 = scmp.lt.s32.totalorder %s71_s23, %s71_s23 }
  0x5e   :  { %p1093_p1 = scmp.ne.s32.totalorder %s71_s23, %s1092_s2  ;;  %p1098_p3 = scmp.lt.s32.totalorder %s1092_s2, %s1092_s2 }
  0x60   :  { %p1099_p4 = por %p1098_p3, %p1097_p2 }
  0x62   :  { %p1100_p5 = pnand %p1099_p4, %p1093_p1 }
  0x64   :  { %1103 = shalt.err (!%p1100_p5)
}
  0x65   :  { %76 = dma.hbm_to_vmem [thread:$0]  %s1399_s5, 256, %s71_s23, [#allocation10], %s1159_s15, %s1159_s15, %s1160_s16  }
  0x66   :  { %s1104_s12 = scalar_lea.hbm %s1401_s7, 256 }
  0x67   :  { %p1105_p6 = scmp.ne.s32.totalorder %s1401_s7, %s1104_s12  ;;  %p1108_p7 = scmp.lt.u32.totalorder %s1104_s12, %s1401_s7 }
  0x69   :  { %p1110_p8 = pnand %p1108_p7, %p1105_p6 }
  0x6b   :  { %1113 = shalt.err (!%p1110_p8)
}
  0x6c   :  { %s1114_s19 = scalar_lea.vmem %s95_s26, 256  ;;  %p1119_p10 = scmp.lt.s32.totalorder %s95_s26, %s95_s26 }
  0x6d   :  { %p1115_p9 = scmp.ne.s32.totalorder %s95_s26, %s1114_s19  ;;  %p1120_p11 = scmp.lt.s32.totalorder %s1114_s19, %s1114_s19 }
  0x6f   :  { %p1121_p12 = por %p1120_p11, %p1119_p10 }
  0x71   :  { %p1122_p13 = pnand %p1121_p12, %p1115_p9 }
  0x73   :  { %1125 = shalt.err (!%p1122_p13)
}
  0x74   :  { %100 = dma.hbm_to_vmem [thread:$0]  %s1401_s7, 256, %s95_s26, [#allocation13], %s1159_s15, %s1159_s15, %s1160_s16  }
  0x75   :  { %1148 = dma.done.wait [#allocation4], 64  }
  0x76   :  { %1149 = vsyncadd [#allocation4], 4294967232 }
  0x77   :  { %1150 = dma.done.wait [#allocation7], 1088  }
  0x78   :  { %1151 = vsyncadd [#allocation7], 4294966208 }
  0x79   :  { %1152 = dma.done.wait [#allocation10], 512  }
  0x7a   :  { %1153 = vsyncadd [#allocation10], 4294966784 }
  0x7b   :  { %1154 = dma.done.wait [#allocation13], 512  }
  0x7c   :  { %1155 = vsyncadd [#allocation13], 4294966784  ;;  %v1167_v0 = vmov 0   ;;  %v122_v1 = vld [vmem:[#allocation6] sm:$0xff]  ;;  %v123_v2 = vld [vmem:[#allocation6 + $0x8] sm:$0xff]  ;;  %vm150_vm0 = vcmask 130048  }
  0x7d   :  { %962 = vset.pattern.permute.xlu0 %v1167_v0  ;;  %963 = vset.pattern.permute.xlu1 %v1167_v0  ;;  %v124_v3 = vld [vmem:[#allocation6 + $0x10] sm:$0xff]  ;;  %v125_v4 = vld [vmem:[#allocation6 + $0x18] sm:$0xff]  ;;  %v808_v6 = vadd.f32 %v123_v2, %v122_v1  ;;  %v126_v7 = vld [vmem:[#allocation6 + $0x20] sm:$0xff]  ;;  %vm693_vm1 = vcmask 1040384   ;;  %vm695_vm2 = vcmask 1041408   ;;  %vm697_vm3 = vcmask 1042432  }
  0x7e   :  { %v1313_v5 = vmul.f32 %v124_v3, %v122_v1  ;;  %v127_v8 = vld [vmem:[#allocation6 + $0x28] sm:$0xff]  ;;  %v1315_v9 = vmul.f32 %v125_v4, %v123_v2  ;;  %v1317_v10 = vmul.f32 %v126_v7, %v122_v1  ;;  %v128_v13 = vld [vmem:[#allocation6 + $0x30] sm:$0xff]  ;;  %v1321_v14 = vmul.f32 %v126_v7, %v124_v3  ;;  %v129_v16 = vld [vmem:[#allocation6 + $0x38] sm:$0xff]  ;;  %s1168_s16 = smov [#allocation15]  }
  0x7f   :  { %v1319_v11 = vmul.f32 %v127_v8, %v123_v2  ;;  %v130_v12 = vld [vmem:[#allocation9] sm:$0xff]  ;;  %v809_v15 = vadd.f32 %v808_v6, %v124_v3  ;;  %v1325_v17 = vmul.f32 %v128_v13, %v122_v1  ;;  %v1327_v18 = vmul.f32 %v127_v8, %v125_v4  ;;  %v132_v19 = vld [vmem:[#allocation11] sm:$0xff]  ;;  %v133_v31 = vld [vmem:[#allocation11 + $0x8] sm:$0xff]  ;;  %s836_s0 = sshll.u32 %s1168_s16, 4  ;;  %s837_s0 = int_to_ptr.vmem [resolvable:$true] %s836_s0 }
  0x80   :  { %889 = vmatprep.mubr.msk.f32.mxu0 %vm150_vm0, %v130_v12  ;;  %896 = vmatprep.mubr.msk.f32.mxu1 %vm150_vm0, %v130_v12  ;;  %v927_v20 = vpack.c.bf16 %v1315_v9, %v1313_v5  ;;  %v1333_v22 = vmul.f32 %v129_v16, %v123_v2  ;;  %v1335_v23 = vmul.f32 %v128_v13, %v124_v3  ;;  %v134_v24 = vld [vmem:[#allocation12] sm:$0xff]  ;;  %v135_v32 = vld [vmem:[#allocation12 + $0x8] sm:$0xff]  ;;  %v791_v40 = vld [vmem:[#allocation8] sm:$0xf]  ;;  %vm701_vm4 = vcmask 1044480   ;;  %s1126_s20 = scalar_lea.vmem %s837_s0, 16  ;;  %p1131_p1 = scmp.lt.s32.totalorder %s837_s0, %s837_s0 }
  0x81   :  { %v931_v21 = vpack.c.bf16 %v1319_v11, %v1317_v10  ;;  %142 = vperm.xlu0 %962, %v132_v19   ;;  %v810_v25 = vadd.f32 %v809_v15, %v125_v4  ;;  %v939_v26 = vpack.c.bf16 %v1327_v18, %v1321_v14  ;;  %v1339_v27 = vmul.f32 %v129_v16, %v125_v4  ;;  %v131_v34 = vld [vmem:[#allocation9 + $0x8] sm:$0xff]  ;;  %v136_v41 = vld [vmem:[#allocation14] sm:$0xff]  ;;  %v137_v42 = vld [vmem:[#allocation14 + $0x8] sm:$0xff]  ;;  %p1127_p0 = scmp.ne.s32.totalorder %s837_s0, %s1126_s20 }
  0x82   :  { %v1341_v28 = vmul.f32 %v128_v13, %v126_v7  ;;  %236 = vperm.xlu1 %963, %v134_v24   ;;  %928 = vmatprep.subr.bf16.mxu0 %v927_v20  ;;  %v935_v29 = vpack.c.bf16 %v1333_v22, %v1325_v17  ;;  %v1345_v30 = vmul.f32 %v129_v16, %v127_v8  ;;  %vm699_vm5 = vcmask 1043456  }
  0x83   :  { %932 = vmatprep.subr.bf16.mxu1 %v931_v21  ;;  %v811_v33 = vadd.f32 %v810_v25, %v126_v7  ;;  %930 = vmatpush3.bf16.msra.mxu0 %v927_v20  ;;  %v943_v36 = vpack.c.bf16 %v1339_v27, %v1335_v23  ;;  %vm703_vm6 = vcmask 1045504  }
  0x84   :  { %934 = vmatpush3.bf16.msra.mxu1 %v931_v21  ;;  %936 = vmatprep.subr.bf16.mxu0 %v935_v29  ;;  %v947_v37 = vpack.c.bf16 %v1345_v30, %v1341_v28 }
  0x85   :  { %940 = vmatprep.subr.bf16.mxu1 %v939_v26  ;;  %v812_v35 = vadd.f32 %v811_v33, %v127_v8  ;;  %147 = vperm.xlu0 %962, %v133_v31  }
  0x86   :  { %241 = vperm.xlu1 %963, %v135_v32   ;;  %890 = vmatmul.mubr.msk.f32.vlgmr.msra.gmra.mrb[0].mxu0 %vm150_vm0, %v131_v34 }
  0x87   :  { %897 = vmatmul.mubr.msk.f32.vlgmr.msra.gmra.mrb[0].mxu1 %vm150_vm0, %v131_v34  ;;  %v813_v38 = vadd.f32 %v812_v35, %v128_v13  ;;  %938 = vmatpush3.bf16.msra.mxu0 %v935_v29 }
  0x88   :  { %942 = vmatpush3.bf16.msra.mxu1 %v939_v26  ;;  %903 = vmatprep.mubr.msk.f32.mxu0 %vm150_vm0, %v130_v12 }
  0x89   :  { %910 = vmatprep.mubr.msk.f32.mxu1 %vm150_vm0, %v130_v12  ;;  %v1355_v39 = vadd.f32 %v813_v38, %v129_v16  ;;  %944 = vmatprep.subr.bf16.mxu0 %v943_v36 }
  0x8a   :  { %948 = vmatprep.subr.bf16.mxu1 %v947_v37  ;;  %904 = vmatmul.mubr.msk.f32.vlgmr.msra.gmra.mrb[2].mxu0 %vm150_vm0, %v131_v34 }
  0x8b   :  { %911 = vmatmul.mubr.msk.f32.vlgmr.msra.gmra.mrb[2].mxu1 %vm150_vm0, %v131_v34  ;;  %946 = vmatpush3.bf16.msra.mxu0 %v943_v36 }
  0x8c   :  { %950 = vmatpush3.bf16.msra.mxu1 %v947_v37  ;;  %917 = vmatprep.mubr.msk.f32.mxu0 %vm150_vm0, %v130_v12 }
  0x8d   :  { %924 = vmatprep.mubr.msk.f32.mxu1 %vm150_vm0, %v130_v12  ;;  %794 = vperm.xlu0 %962, %v791_v40  }
  0x8e   :  { %773 = vperm.xlu1 %963, %v136_v41   ;;  %918 = vmatmul.mubr.msk.f32.vlgmr.msra.gmra.mrb[4].mxu0 %vm150_vm0, %v131_v34 }
  0x8f   :  { %925 = vmatmul.mubr.msk.f32.vlgmr.msra.gmra.mrb[4].mxu1 %vm150_vm0, %v131_v34 }
  0x91   :  { %778 = vperm.xlu0 %962, %v137_v42  }
 0x100   :  { %v143_v43 = vpop.permute.xlu0 %142 }
 0x101   :  { %v237_v44 = vpop.permute.xlu1 %236 }
 0x104   :  { %v148_v45 = vpop.permute.xlu0 %147 }
 0x105   :  { %v242_v56 = vpop.permute.xlu1 %241 }
 0x159   :  { %v891_v46 = vpop.f32.mrb[0].mxu0 }
 0x15a   :  { %v898_v47 = vpop.f32.mrb[0].mxu1  ;;  %v229_v48 = vadd.f32 %v891_v46, %v148_v45  ;;  %v223_v50 = vpop.f32.mrb[1].mxu0 }
 0x15b   :  { %v327_v49 = vadd.f32 %v898_v47, %v148_v45  ;;  %v321_v51 = vpop.f32.mrb[1].mxu1  ;;  %v224_v52 = vadd.f32 %v223_v50, %v143_v43 }
 0x15c   :  { %v322_v53 = vadd.f32 %v321_v51, %v143_v43  ;;  %v233_v54 = vmax.f32 %v229_v48, 0.0 }
 0x15d   :  { %v331_v55 = vmax.f32 %v327_v49, 0.0  ;;  %v232_v57 = vmax.f32 %v224_v52, 0.0  ;;  %v905_v59 = vpop.f32.mrb[2].mxu0 }
 0x15e   :  { %v330_v58 = vmax.f32 %v322_v53, 0.0  ;;  %v912_v60 = vpop.f32.mrb[2].mxu1  ;;  %v245_v61 = vmul.f32 %v242_v56, %v233_v54  ;;  %v415_v63 = vadd.f32 %v905_v59, %v148_v45  ;;  %v409_v1 = vpop.f32.mrb[3].mxu0 }
 0x15f   :  { %v333_v62 = vmul.f32 %v331_v55, %v242_v56  ;;  %v503_v0 = vadd.f32 %v912_v60, %v148_v45  ;;  %v497_v2 = vpop.f32.mrb[3].mxu1  ;;  %v244_v3 = vmul.f32 %v237_v44, %v232_v57  ;;  %v410_v6 = vadd.f32 %v409_v1, %v143_v43 }
 0x160   :  { %v332_v4 = vmul.f32 %v330_v58, %v237_v44  ;;  %v498_v7 = vadd.f32 %v497_v2, %v143_v43  ;;  %v419_v8 = vmax.f32 %v415_v63, 0.0 }
 0x161   :  { %v507_v12 = vmax.f32 %v503_v0, 0.0  ;;  %v246_v13 = vadd.f32 %v245_v61, %v244_v3  ;;  %v418_v16 = vmax.f32 %v410_v6, 0.0  ;;  %v919_v20 = vpop.f32.mrb[4].mxu0 }
 0x162   :  { %v334_v15 = vadd.f32 %v333_v62, %v332_v4  ;;  %v506_v19 = vmax.f32 %v498_v7, 0.0  ;;  %v926_v21 = vpop.f32.mrb[4].mxu1  ;;  %v421_v24 = vmul.f32 %v419_v8, %v242_v56  ;;  %v591_v26 = vadd.f32 %v919_v20, %v148_v45  ;;  %v585_v31 = vpop.f32.mrb[5].mxu0 }
 0x163   :  { %v509_v25 = vmul.f32 %v507_v12, %v242_v56  ;;  %v679_v29 = vadd.f32 %v926_v21, %v148_v45  ;;  %v673_v32 = vpop.f32.mrb[5].mxu1  ;;  %v247_v33 = vrot.slane %v246_v13, 4  ;;  %v420_v35 = vmul.f32 %v418_v16, %v237_v44 }
 0x164   :  { %v335_v34 = vrot.slane %v334_v15, 4  ;;  %v508_v36 = vmul.f32 %v506_v19, %v237_v44  ;;  %v595_v37 = vmax.f32 %v591_v26, 0.0  ;;  %v586_v40 = vadd.f32 %v585_v31, %v143_v43 }
 0x165   :  { %v683_v38 = vmax.f32 %v679_v29, 0.0  ;;  %v674_v41 = vadd.f32 %v673_v32, %v143_v43  ;;  %v248_v42 = vadd.f32 %v247_v33, %v246_v13  ;;  %v422_v47 = vadd.f32 %v421_v24, %v420_v35 }
 0x166   :  { %v336_v46 = vadd.f32 %v335_v34, %v334_v15  ;;  %v510_v48 = vadd.f32 %v509_v25, %v508_v36  ;;  %v597_v49 = vmul.f32 %v595_v37, %v242_v56  ;;  %v594_v51 = vmax.f32 %v586_v40, 0.0 }
 0x167   :  { %v685_v50 = vmul.f32 %v683_v38, %v242_v56  ;;  %v682_v52 = vmax.f32 %v674_v41, 0.0  ;;  %v249_v53 = vrot.slane %v248_v42, 2  ;;  %v423_v54 = vrot.slane %v422_v47, 4 }
 0x168   :  { %v337_v45 = vrot.slane %v336_v46, 2  ;;  %v511_v55 = vrot.slane %v510_v48, 4  ;;  %v596_v57 = vmul.f32 %v594_v51, %v237_v44 }
 0x169   :  { %v684_v58 = vmul.f32 %v682_v52, %v237_v44  ;;  %v250_v59 = vadd.f32 %v249_v53, %v248_v42  ;;  %v424_v61 = vadd.f32 %v423_v54, %v422_v47 }
 0x16a   :  { %v338_v60 = vadd.f32 %v337_v45, %v336_v46  ;;  %v512_v62 = vadd.f32 %v511_v55, %v510_v48  ;;  %v598_v63 = vadd.f32 %v597_v49, %v596_v57 }
 0x16b   :  { %v686_v43 = vadd.f32 %v685_v50, %v684_v58  ;;  %v251_v0 = vrot.slane %v250_v59, 1  ;;  %v425_v2 = vrot.slane %v424_v61, 2 }
 0x16c   :  { %v339_v1 = vrot.slane %v338_v60, 1  ;;  %v513_v3 = vrot.slane %v512_v62, 2  ;;  %v599_v56 = vrot.slane %v598_v63, 4 }
 0x16d   :  { %v687_v4 = vrot.slane %v686_v43, 4  ;;  %v252_v6 = vadd.f32 %v251_v0, %v250_v59  ;;  %v426_v8 = vadd.f32 %v425_v2, %v424_v61  ;;  %v790_v61 = vld [vmem:[#allocation3] sm:$0xf] }
 0x16e   :  { %v340_v7 = vadd.f32 %v339_v1, %v338_v60  ;;  %v514_v12 = vadd.f32 %v513_v3, %v512_v62  ;;  %v600_v13 = vadd.f32 %v599_v56, %v598_v63  ;;  %v723_v60 = vlaneseq  ;;  %v795_v62 = vpop.permute.xlu0 %794 }
 0x16f   :  { %v688_v15 = vadd.f32 %v687_v4, %v686_v43  ;;  %v427_v44 = vrot.slane %v426_v8, 1  ;;  %v797_v63 = vmul.f32 %v795_v62, %v790_v61 }
 0x170   :  { %v694_v16 = vsel %vm693_vm1, %v252_v6, %v340_v7  ;;  %v515_v19 = vrot.slane %v514_v12, 1  ;;  %v601_v20 = vrot.slane %v600_v13, 2  ;;  %v724_v43 = vshrl.u32 %v723_v60, 7 }
 0x171   :  { %v689_v21 = vrot.slane %v688_v15, 2  ;;  %v428_v24 = vadd.f32 %v427_v44, %v426_v8  ;;  %v798_v0 = vsel %vm699_vm5, %v797_v63, 0.0 }
 0x172   :  { %v516_v25 = vadd.f32 %v515_v19, %v514_v12  ;;  %v602_v26 = vadd.f32 %v601_v20, %v600_v13  ;;  %v725_v1 = vsub.s32 0, %v724_v43  ;;  %v733_v2 = vsub.s32 1, %v724_v43 }
 0x173   :  { %v690_v29 = vadd.f32 %v689_v21, %v688_v15  ;;  %v696_v31 = vsel %vm695_vm2, %v694_v16, %v428_v24  ;;  %v741_v3 = vsub.s32 2, %v724_v43  ;;  %v749_v4 = vsub.s32 3, %v724_v43 }
 0x174   :  { %v698_v32 = vsel %vm697_vm3, %v696_v31, %v516_v25  ;;  %v603_v33 = vrot.slane %v602_v26, 1  ;;  %v799_v7 = vrot.slane %v798_v0, 4  ;;  %v757_v8 = vsub.s32 4, %v724_v43 }
 0x175   :  { %v691_v34 = vrot.slane %v690_v29, 1  ;;  %v765_v16 = vsub.s32 5, %v724_v43  ;;  %v815_v25 = vrot.slane %v1355_v39, 4 }
 0x176   :  { %v604_v35 = vadd.f32 %v603_v33, %v602_v26  ;;  %v800_v26 = vadd.f32 %v799_v7, %v798_v0 }
 0x177   :  { %v692_v36 = vadd.f32 %v691_v34, %v690_v29 }
 0x178   :  { %v700_v37 = vsel %vm699_vm5, %v698_v32, %v604_v35 }
 0x179   :  { %v702_v38 = vsel %vm701_vm4, %v700_v37, %v692_v36 }
 0x17a   :  { %v704_v40 = vsel %vm703_vm6, %v702_v38, -inf }
 0x17b   :  { %v705_v41 = vrot.slane %v704_v40, 4 }
 0x17d   :  { %v706_v42 = vmax.f32 %v704_v40, %v705_v41 }
 0x17f   :  { %v707_v46 = vrot.slane %v706_v42, 2 }
 0x181   :  { %v708_v47 = vmax.f32 %v706_v42, %v707_v46 }
 0x183   :  { %v709_v48 = vrot.slane %v708_v47, 1 }
 0x185   :  { %v710_v49 = vmax.f32 %v708_v47, %v709_v48 }
 0x187   :  { %v711_v50 = vsub.f32 %v702_v38, %v710_v49 }
 0x189   :  { %v712_v51 = vmul.f32 1.442695, %v711_v50 }
 0x18b   :  { %964 = vpow2.f32 %v712_v51  ;;  %v774_v51 = vpop.permute.xlu1 %773 }
 0x195   :  { %v965_v52 = vpop.eup %964 }
 0x196   :  { %v714_v53 = vsel %vm703_vm6, %v965_v52, 0.0 }
 0x197   :  { %v715_v45 = vrot.slane %v714_v53, 4 }
 0x199   :  { %v716_v54 = vadd.f32 %v715_v45, %v714_v53 }
 0x19b   :  { %v717_v55 = vrot.slane %v716_v54, 2 }
 0x19d   :  { %v718_v57 = vadd.f32 %v717_v55, %v716_v54 }
 0x19f   :  { %v719_v58 = vrot.slane %v718_v57, 1 }
 0x1a1   :  { %v720_v59 = vadd.f32 %v719_v58, %v718_v57 }
 0x1a3   :  { %966 = vrcp.f32 %v720_v59 }
 0x1ad   :  { %v967_v56 = vpop.eup %966 }
 0x1ae   :  { %v722_v6 = vmul.f32 %v967_v56, %v965_v52 }
 0x1b0   :  { %v726_v12 = vrot.slane %v722_v6, %v725_v1  ;;  %v734_v13 = vrot.slane %v722_v6, %v733_v2  ;;  %v742_v15 = vrot.slane %v722_v6, %v741_v3  ;;  %v750_v44 = vrot.slane %v722_v6, %v749_v4 }
 0x1b1   :  { %v758_v29 = vrot.slane %v722_v6, %v757_v8  ;;  %v766_v35 = vrot.slane %v722_v6, %v765_v16 }
 0x1b2   :  { %v727_v19 = vmul.f32 %v726_v12, %v1313_v5  ;;  %v728_v20 = vmul.f32 %v726_v12, %v1315_v9  ;;  %v735_v21 = vmul.f32 %v734_v13, %v1317_v10  ;;  %v736_v24 = vmul.f32 %v734_v13, %v1319_v11 }
 0x1b3   :  { %v743_v33 = vmul.f32 %v742_v15, %v1325_v17  ;;  %v744_v34 = vmul.f32 %v742_v15, %v1333_v22  ;;  %v751_v5 = vmul.f32 %v750_v44, %v1321_v14  ;;  %v752_v9 = vmul.f32 %v750_v44, %v1327_v18  ;;  %v779_v18 = vpop.permute.xlu0 %778 }
 0x1b4   :  { %v737_v31 = vadd.f32 %v735_v21, %v727_v19  ;;  %v738_v32 = vadd.f32 %v736_v24, %v728_v20  ;;  %v816_v10 = vadd.f32 %v815_v25, %v1355_v39  ;;  %v801_v11 = vrot.slane %v800_v26, 2 }
 0x1b5   :  { %v759_v41 = vmul.f32 %v758_v29, %v1335_v23  ;;  %v760_v42 = vmul.f32 %v758_v29, %v1339_v27  ;;  %v767_v22 = vmul.f32 %v766_v35, %v1341_v28  ;;  %v768_v47 = vmul.f32 %v766_v35, %v1345_v30 }
 0x1b6   :  { %v745_v36 = vadd.f32 %v743_v33, %v737_v31  ;;  %v746_v37 = vadd.f32 %v744_v34, %v738_v32  ;;  %v802_v48 = vadd.f32 %v801_v11, %v800_v26  ;;  %v817_v49 = vrot.slane %v816_v10, 2 }
 0x1b7   :  { %v806_v28 = vstv %s1397_s3  ;;  %s1130_s3 = scalar_lea.vmem %s837_s0, 32 }
 0x1b8   :  { %v753_v38 = vadd.f32 %v751_v5, %v745_v36  ;;  %v754_v40 = vadd.f32 %v752_v9, %v746_v37  ;;  %v803_v53 = vrot.slane %v802_v48, 1  ;;  %v818_v45 = vadd.f32 %v817_v49, %v816_v10  ;;  %p1132_p2 = scmp.lt.s32.totalorder %s1130_s3, %s1126_s20 }
 0x1ba   :  { %v761_v46 = vadd.f32 %v759_v41, %v753_v38  ;;  %v762_v17 = vadd.f32 %v760_v42, %v754_v40  ;;  %v804_v55 = vadd.f32 %v803_v53, %v802_v48  ;;  %v819_v27 = vrot.slane %v818_v45, 1  ;;  %p1133_p3 = por %p1132_p2, %p1131_p1 }
 0x1bc   :  { %v769_v14 = vadd.f32 %v767_v22, %v761_v46  ;;  %v770_v50 = vadd.f32 %v768_v47, %v762_v17  ;;  %v807_v58 = vadd.f32 %v806_v28, %v804_v55  ;;  %v820_v59 = vadd.f32 %v819_v27, %v818_v45  ;;  %p1134_p4 = pnand %p1133_p3, %p1127_p0 }
 0x1be   :  { %v781_v39 = vmul.f32 %v774_v51, %v769_v14  ;;  %v782_v52 = vmul.f32 %v779_v18, %v770_v50  ;;  %v821_v62 = vadd.f32 %v820_v59, %v807_v58 }
 0x1c0   :  { %v783_v54 = vadd.f32 %v782_v52, %v781_v39 }
 0x1c2   :  { %v784_v23 = vrot.slane %v783_v54, 4 }
 0x1c4   :  { %v785_v57 = vadd.f32 %v784_v23, %v783_v54 }
 0x1c6   :  { %v786_v30 = vrot.slane %v785_v57, 2 }
 0x1c8   :  { %v787_v60 = vadd.f32 %v786_v30, %v785_v57 }
 0x1ca   :  { %v788_v61 = vrot.slane %v787_v60, 1 }
 0x1cc   :  { %v789_v63 = vadd.f32 %v788_v61, %v787_v60 }
 0x1ce   :  { %v822_v43 = vadd.f32 %v821_v62, %v789_v63 }
 0x1d0   :  { %v860_v0 = vmul.f32 -1.442695, %v822_v43 }
 0x1d2   :  { %968 = vpow2.f32 %v860_v0 }
 0x1dc   :  { %v969_v1 = vpop.eup %968 }
 0x1dd   :  { %v826_v2 = vadd.f32 1.0, %v969_v1 }
 0x1df   :  { %970 = vrcp.f32 %v826_v2 }
 0x1e9   :  { %v971_v3 = vpop.eup %970 }
 0x1ea   :  { %829 = vst [vmem:[#allocation15] sm:$0x1] %v971_v3 }
 0x1eb   :  { %1137 = shalt.err (!%p1134_p4)
}
 0x1ec   :  { %s1138_s24 = scalar_lea.hbm %s1402_s8, 16 }
 0x1ed   :  { %p1139_p5 = scmp.ne.s32.totalorder %s1402_s8, %s1138_s24  ;;  %p1142_p6 = scmp.lt.u32.totalorder %s1138_s24, %s1402_s8 }
 0x1ef   :  { %p1144_p7 = pnand %p1142_p6, %p1139_p5 }
 0x1f1   :  { %1147 = shalt.err (!%p1144_p7)
}
 0x1f2   :  { %839 = dma.vmem_to_hbm [thread:$0]  %s837_s0, 16, %s1402_s8, [#allocation5]  }
 0x1f3   :  { %1156 = dma.done.wait [#allocation5], 16  }
 0x1f4   :  { %1157 = vsyncadd [#allocation5], 4294967280 }
 0x1f5   :  { %843 = vsyncpa [#allocation4], 1 }
 0x1f6   :  { %844 = vsyncpa [#allocation7], 1 }
 0x1f7   :  { %845 = vsyncpa [#allocation10], 1 }
 0x1f8   :  { %846 = vsyncpa [#allocation13], 1 }
 0x1f9   :  { %847 = vsyncpa [#allocation5], 1 }

</bundles_post_ra>
